<compile_context>
chip_gen: v5e
topology: v5e:2x2
jax: 0.10.0
libtpu: 0.0.40
codegen_flags: <defaults>
</compile_context>

<pallas_src>
from typing import NamedTuple

import jax
import jax.numpy as jnp
from jax.experimental import pallas as pl
from jax.experimental.pallas import tpu as pltpu


# ----------------------------- Pallas kernel ------------------------------- #
def _embedding_encoder_kernel(fid_ref, tab_ref, bias_ref, out_ref):
    # fid_ref : (TILE_R, 2*GROUP) int32  -- [word ids | Vw + pos ids]; -1 = "no row"
    # tab_ref : (GROUP, VWP_PAD, GROUP*CTX)  per-slot folded (emb ∘ Linear) table;
    #           slot j holds [Fw; Fp] on rows, written into lanes [j*CTX,(j+1)*CTX)
    # bias_ref: (1, GROUP*CTX) f32
    # out_ref : (TILE_R, GROUP*CTX)
    group, vwp, _ = tab_ref.shape
    ids = fid_ref[...]                                          # (TILE_R, 2G)
    # Small grid-invariant local iota (one vreg row), broadcast by the compares.
    col = jax.lax.broadcasted_iota(jnp.int32, (1, vwp), 1)

    # Per-slot local one-hot: slot j's ids can only land in slot j's Vw+Vp
    # rows, so each compare scans only (Vw+Vp) columns and there is no
    # 2*group-wide OR tree (the previous VALU bottleneck).
    acc = None
    for j in range(group):                                      # static unroll
        hit = (col == ids[:, j:j + 1]) | (col == ids[:, group + j:group + j + 1])
        onehot = hit.astype(tab_ref.dtype)                      # exact 0/1
        part = jnp.dot(onehot, tab_ref[j],
                       preferred_element_type=jnp.float32)      # (TILE_R, G*CTX)
        acc = part if acc is None else acc + part
    # f32 bias-add + tanh on every generation (v5e has no bf16 VPU/EUP);
    # the optional down-cast to bf16 happens only at the store.
    out_ref[...] = jnp.tanh(acc + bias_ref[...]).astype(out_ref.dtype)


# ------------------------------ host helpers -------------------------------- #
def _round_up(x: int, m: int) -> int:
    return ((x + m - 1) // m) * m


class FoldedParams(NamedTuple):
    table: jax.Array      # (group, Vwp_pad, group*ctx)  folded emb ∘ Linear
    bias: jax.Array       # (1, group*ctx) f32
    word_vocab: int
    pos_vocab: int
    ctx: int
    group: int


def fold_params(word_table, pos_table, lin_w, lin_b, *, table_dtype=jnp.bfloat16):
    """One-time parameter transformation — call at init, NOT per forward.

    table_dtype=bfloat16 is a documented precision/perf tradeoff (the one-hot
    is exact; accumulation stays f32); pass jnp.float32 for full precision.
    """
    Vw, Dw = word_table.shape
    Vp, Dp = pos_table.shape
    ctx = lin_w.shape[0]
    assert lin_w.shape[1] == Dw + Dp

    # Lane-dense packing: GROUP tokens share one 128-lane output row.
    # (If ctx does not divide 128 we fall back to group=1 — correct, but the
    #  output stores are then sub-128-lane / masked.)
    group = 128 // ctx if (ctx <= 128 and 128 % ctx == 0) else 1
    lane_out = group * ctx

    hi = jax.lax.Precision.HIGHEST          # one-time cost; keep the fold exact
    lw = lin_w.astype(jnp.float32)
    fw = jnp.matmul(word_table.astype(jnp.float32), lw[:, :Dw].T, precision=hi)
    fp = jnp.matmul(pos_table.astype(jnp.float32), lw[:, Dw:].T, precision=hi)

    vwp = Vw + Vp
    vwp_pad = _round_up(vwp, 16)            # sublane alignment (bf16 & f32 tiling)
    tab = jnp.zeros((group, vwp_pad, lane_out), jnp.float32)
    for j in range(group):
        tab = tab.at[j, :Vw, j * ctx:(j + 1) * ctx].set(fw)
        tab = tab.at[j, Vw:vwp, j * ctx:(j + 1) * ctx].set(fp)
    tab = tab.astype(table_dtype)
    bias = jnp.tile(lin_b.astype(jnp.float32), group).reshape(1, lane_out)
    return FoldedParams(tab, bias, Vw, Vp, ctx, group)


def embedding_encoder(words, pos, params: FoldedParams, *,
                      tile_tokens: int = 2048, out_dtype=jnp.float32):
    """
    words, pos : int [B, S] token / pos-tag ids.  Out-of-range or negative ids
                 contribute an exact zero embedding row (nn.Embedding would
                 raise); padding_idx rows are zero because the tables are.
    returns    : [B, S, ctx] in `out_dtype` (bf16 output halves HBM writeback
                 on v5e/v6e; accumulation + tanh stay f32).
    """
    B, S = words.shape
    group, ctx = params.group, params.ctx
    Vw, Vp = params.word_vocab, params.pos_vocab
    lane_out = group * ctx
    n_tok = B * S

    # Token tiling: tile_r = tile_tokens // group output rows per grid step.
    tile_tokens = max(8 * group, (tile_tokens // (8 * group)) * (8 * group))
    tile_tokens = min(tile_tokens, _round_up(n_tok, 8 * group))
    n_pad = _round_up(n_tok, tile_tokens)
    r_pad = n_pad // group
    tile_r = tile_tokens // group

    # Pack ids into one (r_pad, 2*group) int32 stream; OOB / pad -> -1 sentinel.
    wid = words.reshape(-1).astype(jnp.int32)
    pid = pos.reshape(-1).astype(jnp.int32)
    wid = jnp.where((wid >= 0) & (wid < Vw), wid, -1)
    pid = jnp.where((pid >= 0) & (pid < Vp), Vw + pid, -1)
    wid = jnp.full((n_pad,), -1, jnp.int32).at[:n_tok].set(wid)
    pid = jnp.full((n_pad,), -1, jnp.int32).at[:n_tok].set(pid)
    fid = jnp.concatenate([wid.reshape(-1, group), pid.reshape(-1, group)],
                          axis=1)                               # (r_pad, 2*group)

    tab, bias = params.table, params.bias
    cost = pl.CostEstimate(
        flops=2 * r_pad * group * tab.shape[1] * lane_out,
        transcendentals=r_pad * lane_out,
        bytes_accessed=(fid.size * 4 + tab.size * tab.dtype.itemsize
                        + bias.size * 4
                        + r_pad * lane_out * jnp.dtype(out_dtype).itemsize))

    out = pl.pallas_call(
        _embedding_encoder_kernel,
        out_shape=jax.ShapeDtypeStruct((r_pad, lane_out), out_dtype),
        grid_spec=pltpu.PrefetchScalarGridSpec(
            num_scalar_prefetch=0,
            grid=(r_pad // tile_r,),
            in_specs=[
                pl.BlockSpec((tile_r, 2 * group), lambda i: (i, 0)),
                # Resident constants (constant index_map -> fetched once).
                # TODO(synk): single-buffer (pl.Buffered(1)) / gather path for
                # large vocab tables (group^2 inflation vs v7x's 64 MiB VMEM).
                pl.BlockSpec(tab.shape, lambda i: (0, 0, 0)),
                pl.BlockSpec(bias.shape, lambda i: (0, 0)),
            ],
            out_specs=pl.BlockSpec((tile_r, lane_out), lambda i: (i, 0)),
        ),
        compiler_params=pltpu.CompilerParams(
            # TODO(synk): CORE_PARALLEL / pl.core_map on v7x for 2-TC sharding.
            dimension_semantics=("parallel",),
            vmem_limit_bytes=32 * 1024 * 1024),
        cost_estimate=cost,
    )(fid, tab, bias)

    # Unpack lane-dense rows -> per-token rows, drop padding.
    return out.reshape(n_pad, ctx)[:n_tok].reshape(B, S, ctx)


# ------------------------- deterministic param init ------------------------- #
def xavier_normal(key, shape):
    fan_out, fan_in = shape
    std = (2.0 / (fan_in + fan_out)) ** 0.5
    return std * jax.random.normal(key, shape, dtype=jnp.float32)


def _reference(words, pos, word_table, pos_table, lin_w, lin_b):
    """Pure-JAX f32 reference matching the PyTorch forward."""
    cat = jnp.concatenate([word_table[words], pos_table[pos]], axis=-1)
    z = jnp.matmul(cat, lin_w.T, precision=jax.lax.Precision.HIGHEST) + lin_b
    return jnp.tanh(z)


if __name__ == "__main__":
    # "options": word_vocab=32, pos_vocab=16, word_emb=16, pos_emb=16,
    # context_linear_dim=32, padding_idx=0, use_non_linear_trans=True, xavier.
    B, S = 2, 8
    WORD_VOCAB, POS_VOCAB = 32, 16
    WORD_DIM, POS_DIM = 16, 16
    CTX_DIM = 32
    PAD = 0

    key = jax.random.PRNGKey(0)
    k_wt, k_pt, k_lw, k_wi, k_pi, k_wi2, k_pi2 = jax.random.split(key, 7)

    word_table = xavier_normal(k_wt, (WORD_VOCAB, WORD_DIM)).at[PAD].set(0.0)
    pos_table = xavier_normal(k_pt, (POS_VOCAB, POS_DIM)).at[PAD].set(0.0)
    lin_w = xavier_normal(k_lw, (CTX_DIM, WORD_DIM + POS_DIM))
    lin_b = jnp.zeros((CTX_DIM,), jnp.float32)
    # TODO(synk): PyTorch Linear bias default init is uniform(+-1/sqrt(fan_in));
    # zeros kept for determinism simplicity.

    words = jax.random.randint(k_wi, (B, S), 0, WORD_VOCAB, dtype=jnp.int32)
    pos = jax.random.randint(k_pi, (B, S), 0, POS_VOCAB, dtype=jnp.int32)
    ref = _reference(words, pos, word_table, pos_table, lin_w, lin_b)

    # 1) Perf path: bf16 folded table, f32 accumulation, f32 output.
    folded_bf16 = fold_params(word_table, pos_table, lin_w, lin_b,
                              table_dtype=jnp.bfloat16)
    out = jax.block_until_ready(embedding_encoder(words, pos, folded_bf16))
    assert out.shape == (B, S, CTX_DIM)
    assert jnp.allclose(out, ref, atol=1e-2, rtol=1e-2)

    # 2) f32-table path at tight tolerance (guards against bugs the loose
    #    bf16 tolerance could mask).
    folded_f32 = fold_params(word_table, pos_table, lin_w, lin_b,
                             table_dtype=jnp.float32)
    out32 = jax.block_until_ready(embedding_encoder(words, pos, folded_f32))
    assert jnp.allclose(out32, ref, atol=1e-4, rtol=1e-4)

    # 3) Larger run: exercises multi-step grid (tile_r=512, grid=2), token
    #    padding tail, and bf16 output (HBM-writeback win on v5e/v6e).
    B2, S2 = 8, 511
    words2 = jax.random.randint(k_wi2, (B2, S2), 0, WORD_VOCAB, dtype=jnp.int32)
    pos2 = jax.random.randint(k_pi2, (B2, S2), 0, POS_VOCAB, dtype=jnp.int32)
    out2 = jax.block_until_ready(
        embedding_encoder(words2, pos2, folded_bf16, out_dtype=jnp.bfloat16))
    ref2 = _reference(words2, pos2, word_table, pos_table, lin_w, lin_b)
    assert out2.shape == (B2, S2, CTX_DIM)
    assert jnp.allclose(out2.astype(jnp.float32), ref2, atol=2e-2, rtol=2e-2)

    print("KERNEL_OK")
</pallas_src>

<mosaic_0001>
module attributes {stable_mosaic.version = 11 : i64} {
  func.func @_embedding_encoder_kernel(%arg0: i32, %arg1: memref<8x8xi32, #tpu.memory_space<vmem>>, %arg2: memref<4x48x128xbf16, #tpu.memory_space<vmem>>, %arg3: memref<1x128xf32, #tpu.memory_space<vmem>>, %arg4: memref<8x128xf32, #tpu.memory_space<vmem>>) attributes {dimension_semantics = [#tpu.dimension_semantics<parallel>], iteration_bounds = array<i64: 1>, scalar_prefetch = 0 : i64, scratch_operands = 0 : i64, tpu.core_type = #tpu.core_type<tc>, window_params = [{transform_indices = @transform_0, window_bounds = array<i64: 8, 8>}, {pipeline_mode = #tpu.pipeline_mode<synchronous>, transform_indices = @transform_1, window_bounds = array<i64: 4, 48, 128>}, {pipeline_mode = #tpu.pipeline_mode<synchronous>, transform_indices = @transform_2, window_bounds = array<i64: 1, 128>}, {transform_indices = @transform_3, window_bounds = array<i64: 8, 128>}]} {
    %c0 = arith.constant 0 : index
    %c0_0 = arith.constant 0 : index
    %0 = vector.load %arg1[%c0, %c0_0] : memref<8x8xi32, #tpu.memory_space<vmem>>, vector<8x8xi32>
    %1 = tpu.iota {dimensions = array<i32: 1>} : vector<1x48xi32>
    %2 = vector.extract_strided_slice %0 {offsets = [0, 0], sizes = [8, 1], strides = [1, 1]} : vector<8x8xi32> to vector<8x1xi32>
    %3 = vector.broadcast %1 : vector<1x48xi32> to vector<8x48xi32>
    %4 = vector.broadcast %2 : vector<8x1xi32> to vector<8x48xi32>
    %5 = arith.cmpi eq, %3, %4 : vector<8x48xi32>
    %6 = vector.extract_strided_slice %0 {offsets = [0, 4], sizes = [8, 1], strides = [1, 1]} : vector<8x8xi32> to vector<8x1xi32>
    %7 = vector.broadcast %1 : vector<1x48xi32> to vector<8x48xi32>
    %8 = vector.broadcast %6 : vector<8x1xi32> to vector<8x48xi32>
    %9 = arith.cmpi eq, %7, %8 : vector<8x48xi32>
    %10 = arith.ori %5, %9 : vector<8x48xi1>
    %11 = arith.extui %10 : vector<8x48xi1> to vector<8x48xi32>
    %12 = arith.sitofp %11 : vector<8x48xi32> to vector<8x48xf32>
    %13 = arith.truncf %12 : vector<8x48xf32> to vector<8x48xbf16>
    %c0_1 = arith.constant 0 : index
    %c0_2 = arith.constant 0 : index
    %c0_3 = arith.constant 0 : index
    %14 = vector.load %arg2[%c0_1, %c0_2, %c0_3] : memref<4x48x128xbf16, #tpu.memory_space<vmem>>, vector<1x48x128xbf16>
    %15 = vector.shape_cast %14 : vector<1x48x128xbf16> to vector<48x128xbf16>
    %cst = arith.constant dense<0.000000e+00> : vector<8x128xf32>
    %16 = tpu.matmul %13, %15, %cst {dimension_numbers = #tpu.dot_dimension_numbers<[1], [0], [0], [1], [0, 0, 1, 1], [], []>} : vector<8x48xbf16>, vector<48x128xbf16>, vector<8x128xf32> -> vector<8x128xf32>
    %17 = vector.extract_strided_slice %0 {offsets = [0, 1], sizes = [8, 1], strides = [1, 1]} : vector<8x8xi32> to vector<8x1xi32>
    %18 = vector.broadcast %1 : vector<1x48xi32> to vector<8x48xi32>
    %19 = vector.broadcast %17 : vector<8x1xi32> to vector<8x48xi32>
    %20 = arith.cmpi eq, %18, %19 : vector<8x48xi32>
    %21 = vector.extract_strided_slice %0 {offsets = [0, 5], sizes = [8, 1], strides = [1, 1]} : vector<8x8xi32> to vector<8x1xi32>
    %22 = vector.broadcast %1 : vector<1x48xi32> to vector<8x48xi32>
    %23 = vector.broadcast %21 : vector<8x1xi32> to vector<8x48xi32>
    %24 = arith.cmpi eq, %22, %23 : vector<8x48xi32>
    %25 = arith.ori %20, %24 : vector<8x48xi1>
    %26 = arith.extui %25 : vector<8x48xi1> to vector<8x48xi32>
    %27 = arith.sitofp %26 : vector<8x48xi32> to vector<8x48xf32>
    %28 = arith.truncf %27 : vector<8x48xf32> to vector<8x48xbf16>
    %c1 = arith.constant 1 : index
    %c0_4 = arith.constant 0 : index
    %c0_5 = arith.constant 0 : index
    %29 = vector.load %arg2[%c1, %c0_4, %c0_5] : memref<4x48x128xbf16, #tpu.memory_space<vmem>>, vector<1x48x128xbf16>
    %30 = vector.shape_cast %29 : vector<1x48x128xbf16> to vector<48x128xbf16>
    %cst_6 = arith.constant dense<0.000000e+00> : vector<8x128xf32>
    %31 = tpu.matmul %28, %30, %cst_6 {dimension_numbers = #tpu.dot_dimension_numbers<[1], [0], [0], [1], [0, 0, 1, 1], [], []>} : vector<8x48xbf16>, vector<48x128xbf16>, vector<8x128xf32> -> vector<8x128xf32>
    %32 = arith.addf %16, %31 : vector<8x128xf32>
    %33 = vector.extract_strided_slice %0 {offsets = [0, 2], sizes = [8, 1], strides = [1, 1]} : vector<8x8xi32> to vector<8x1xi32>
    %34 = vector.broadcast %1 : vector<1x48xi32> to vector<8x48xi32>
    %35 = vector.broadcast %33 : vector<8x1xi32> to vector<8x48xi32>
    %36 = arith.cmpi eq, %34, %35 : vector<8x48xi32>
    %37 = vector.extract_strided_slice %0 {offsets = [0, 6], sizes = [8, 1], strides = [1, 1]} : vector<8x8xi32> to vector<8x1xi32>
    %38 = vector.broadcast %1 : vector<1x48xi32> to vector<8x48xi32>
    %39 = vector.broadcast %37 : vector<8x1xi32> to vector<8x48xi32>
    %40 = arith.cmpi eq, %38, %39 : vector<8x48xi32>
    %41 = arith.ori %36, %40 : vector<8x48xi1>
    %42 = arith.extui %41 : vector<8x48xi1> to vector<8x48xi32>
    %43 = arith.sitofp %42 : vector<8x48xi32> to vector<8x48xf32>
    %44 = arith.truncf %43 : vector<8x48xf32> to vector<8x48xbf16>
    %c2 = arith.constant 2 : index
    %c0_7 = arith.constant 0 : index
    %c0_8 = arith.constant 0 : index
    %45 = vector.load %arg2[%c2, %c0_7, %c0_8] : memref<4x48x128xbf16, #tpu.memory_space<vmem>>, vector<1x48x128xbf16>
    %46 = vector.shape_cast %45 : vector<1x48x128xbf16> to vector<48x128xbf16>
    %cst_9 = arith.constant dense<0.000000e+00> : vector<8x128xf32>
    %47 = tpu.matmul %44, %46, %cst_9 {dimension_numbers = #tpu.dot_dimension_numbers<[1], [0], [0], [1], [0, 0, 1, 1], [], []>} : vector<8x48xbf16>, vector<48x128xbf16>, vector<8x128xf32> -> vector<8x128xf32>
    %48 = arith.addf %32, %47 : vector<8x128xf32>
    %49 = vector.extract_strided_slice %0 {offsets = [0, 3], sizes = [8, 1], strides = [1, 1]} : vector<8x8xi32> to vector<8x1xi32>
    %50 = vector.broadcast %1 : vector<1x48xi32> to vector<8x48xi32>
    %51 = vector.broadcast %49 : vector<8x1xi32> to vector<8x48xi32>
    %52 = arith.cmpi eq, %50, %51 : vector<8x48xi32>
    %53 = vector.extract_strided_slice %0 {offsets = [0, 7], sizes = [8, 1], strides = [1, 1]} : vector<8x8xi32> to vector<8x1xi32>
    %54 = vector.broadcast %1 : vector<1x48xi32> to vector<8x48xi32>
    %55 = vector.broadcast %53 : vector<8x1xi32> to vector<8x48xi32>
    %56 = arith.cmpi eq, %54, %55 : vector<8x48xi32>
    %57 = arith.ori %52, %56 : vector<8x48xi1>
    %58 = arith.extui %57 : vector<8x48xi1> to vector<8x48xi32>
    %59 = arith.sitofp %58 : vector<8x48xi32> to vector<8x48xf32>
    %60 = arith.truncf %59 : vector<8x48xf32> to vector<8x48xbf16>
    %c3 = arith.constant 3 : index
    %c0_10 = arith.constant 0 : index
    %c0_11 = arith.constant 0 : index
    %61 = vector.load %arg2[%c3, %c0_10, %c0_11] : memref<4x48x128xbf16, #tpu.memory_space<vmem>>, vector<1x48x128xbf16>
    %62 = vector.shape_cast %61 : vector<1x48x128xbf16> to vector<48x128xbf16>
    %cst_12 = arith.constant dense<0.000000e+00> : vector<8x128xf32>
    %63 = tpu.matmul %60, %62, %cst_12 {dimension_numbers = #tpu.dot_dimension_numbers<[1], [0], [0], [1], [0, 0, 1, 1], [], []>} : vector<8x48xbf16>, vector<48x128xbf16>, vector<8x128xf32> -> vector<8x128xf32>
    %64 = arith.addf %48, %63 : vector<8x128xf32>
    %c0_13 = arith.constant 0 : index
    %c0_14 = arith.constant 0 : index
    %65 = vector.load %arg3[%c0_13, %c0_14] : memref<1x128xf32, #tpu.memory_space<vmem>>, vector<1x128xf32>
    %66 = vector.broadcast %65 : vector<1x128xf32> to vector<8x128xf32>
    %67 = arith.addf %64, %66 : vector<8x128xf32>
    %68 = math.tanh %67 : vector<8x128xf32>
    %c0_15 = arith.constant 0 : index
    %c0_16 = arith.constant 0 : index
    %69 = vector.load %arg4[%c0_15, %c0_16] : memref<8x128xf32, #tpu.memory_space<vmem>>, vector<8x128xf32>
    tpu.vector_store %arg4[%c0_15, %c0_16], %68 {strides = array<i32>} : memref<8x128xf32, #tpu.memory_space<vmem>>, vector<8x128xf32>,
    return
  }
  func.func @transform_0(%arg0: i32) -> (i32, i32) {
    %c0_i32 = arith.constant 0 : i32
    %c0_i32_0 = arith.constant 0 : i32
    return %arg0, %c0_i32 : i32, i32
  }
  func.func @transform_1(%arg0: i32) -> (i32, i32, i32) {
    %c0_i32 = arith.constant 0 : i32
    %c0_i32_0 = arith.constant 0 : i32
    %c0_i32_1 = arith.constant 0 : i32
    %c0_i32_2 = arith.constant 0 : i32
    return %c0_i32, %c0_i32_0, %c0_i32_1 : i32, i32, i32
  }
  func.func @transform_2(%arg0: i32) -> (i32, i32) {
    %c0_i32 = arith.constant 0 : i32
    %c0_i32_0 = arith.constant 0 : i32
    %c0_i32_1 = arith.constant 0 : i32
    return %c0_i32, %c0_i32_0 : i32, i32
  }
  func.func @transform_3(%arg0: i32) -> (i32, i32) {
    %c0_i32 = arith.constant 0 : i32
    %c0_i32_0 = arith.constant 0 : i32
    return %arg0, %c0_i32 : i32, i32
  }
}

</mosaic_0001>

<bundles_post_ra>
// kernel: tpu_custom_call.1
= control target key start
LH: loop header
LB: loop body
LE: loop exit
PB: predicated region body
PF: predicated region fallthrough
CT: control target
= control target key end

     0   :  { %8 = vsyncpa [#allocation3], 0  ;;  %s510_s0 = inlined_call_operand.hbm [shape: s32[8,8], index: 0, kind: input, shape index: {}]   ;;  %s511_s1 = inlined_call_operand.hbm [shape: bf16[4,48,128], index: 1, kind: input, shape index: {}]   ;;  %s512_s2 = inlined_call_operand.vmem [shape: f32[1,128], index: 2, kind: input, shape index: {}]   ;;  %s513_s3 = inlined_call_operand.hbm [shape: f32[8,128], index: 3, kind: output, shape index: {}]  }
   0x1   :  { %9 = vsyncpa [#allocation6], 0 }
   0x2   :  { %10 = vsyncpa [#allocation4], 0  ;;  %s16_s14 = sshll.u32 %s510_s0, 4  ;;  %s460_s15 = smov [#allocation2]   ;;  %s17_s14 = int_to_ptr.hbm [resolvable:$true] %s16_s14 }
   0x3   :  { %s18_s16 = sshll.u32 %s460_s15, 4  ;;  %s26_s19 = sshll.u32 %s511_s1, 4  ;;  %s19_s16 = int_to_ptr.vmem [resolvable:$true] %s18_s16  ;;  %s27_s19 = int_to_ptr.hbm [resolvable:$true] %s26_s19 }
   0x4   :  { %21 = dma.hbm_to_vmem [thread:$0]  %s17_s14, 128, %s19_s16, [#allocation3]  }
   0x5   :  { %s461_s20 = smov [#allocation5]   ;;  %s462_s22 = smov 64  }
   0x6   :  { %s28_s21 = sshll.u32 %s461_s20, 4  ;;  %s463_s23 = smov 4   ;;  %s29_s21 = int_to_ptr.vmem [resolvable:$true] %s28_s21 }
   0x7   :  { %34 = dma.hbm_to_vmem [thread:$0]  %s27_s19, 1536, %s29_s21, [#allocation6], %s462_s22, %s462_s22, %s463_s23  }
   0x8   :  { %454 = dma.done.wait [#allocation3], 128  }
   0x9   :  { %455 = vsyncadd [#allocation3], 4294967168 }
   0xa   :  { %456 = dma.done.wait [#allocation6], 1536  }
   0xb   :  { %457 = vsyncadd [#allocation6], 4294965760  ;;  %v464_v0 = vmov 3   ;;  %v465_v1 = vmov 2   ;;  %v466_v2 = vmov 0   ;;  %v46_v3 = vld [vmem:[#allocation2] sm:$0xff]  ;;  %v47_v17 = vlaneseq }
   0xc   :  { %372 = vset.pattern.permute.xlu1 %v464_v0  ;;  %370 = vset.pattern.permute.xlu0 %v465_v1  ;;  %v467_v4 = vmov 7   ;;  %v468_v5 = vmov 6   ;;  %v469_v6 = vmov 4   ;;  %v470_v7 = vmov 1   ;;  %v346_v9 = vld [vmem:[#allocation5 + $0x10] sm:$0xff]  ;;  %v345_v10 = vld [vmem:[#allocation5 + $0x8] sm:$0xff] }
   0xd   :  { %374 = vset.pattern.permute.xlu2 %v466_v2  ;;  %210 = vperm.xlu1 %372, %v46_v3   ;;  %v471_v8 = vmov 5   ;;  %v344_v11 = vld [vmem:[#allocation5] sm:$0xff]  ;;  %v355_v13 = vld [vmem:[#allocation5 + $0x58] sm:$0xff]  ;;  %v354_v15 = vld [vmem:[#allocation5 + $0x50] sm:$0xff]  ;;  %v48_v21 = vand.u32 127, %v47_v17  ;;  %v472_v25 = vmov 0.0  }
   0xe   :  { %156 = vperm.xlu0 %370, %v46_v3   ;;  %50 = vperm.xlu2 %374, %v46_v3   ;;  %v352_v12 = vld [vmem:[#allocation5 + $0x40] sm:$0xff]  ;;  %v351_v14 = vld [vmem:[#allocation5 + $0x38] sm:$0xff]  ;;  %v350_v18 = vld [vmem:[#allocation5 + $0x30] sm:$0xff]  ;;  %vm104_vm3 = vcmask 392192   ;;  %s473_s24 = smov [#allocation7]   ;;  %s277_s28 = sshll.u32 %s513_s3, 4  ;;  %s278_s28 = int_to_ptr.hbm [resolvable:$true] %s277_s28 }
   0xf   :  { %147 = vmatpush.bf16.msra.mxu1 %v346_v9  ;;  %200 = vmatpush.bf16.msra.mxu2 %v352_v12  ;;  %v353_v19 = vld [vmem:[#allocation5 + $0x48] sm:$0xff]  ;;  %v348_v22 = vld [vmem:[#allocation5 + $0x20] sm:$0xff]  ;;  %v347_v24 = vld [vmem:[#allocation5 + $0x18] sm:$0xff]  ;;  %s275_s25 = sshll.u32 %s473_s24, 4  ;;  %s276_s25 = int_to_ptr.vmem [resolvable:$true] %s275_s25 }
  0x10   :  { %254 = vmatpush.bf16.msra.mxu3 %v355_v13  ;;  %v349_v20 = vld [vmem:[#allocation5 + $0x28] sm:$0xff]  ;;  %v379_v47 = vld [vmem:[%s512_s2] ss:$0 sm:$0xff] }
  0x11   :  { %113 = vmatpush.bf16.msra.mxu0 %v349_v20 }
  0x13   :  { %148 = vmatpush.bf16.msra.mxu1 %v345_v10  ;;  %201 = vmatpush.bf16.msra.mxu2 %v351_v14 }
  0x14   :  { %255 = vmatpush.bf16.msra.mxu3 %v354_v15 }
  0x15   :  { %373 = vset.pattern.permute.xlu1 %v467_v4  ;;  %114 = vmatpush.bf16.msra.mxu0 %v348_v22 }
  0x16   :  { %371 = vset.pattern.permute.xlu0 %v468_v5  ;;  %214 = vperm.xlu1 %373, %v46_v3  }
  0x17   :  { %160 = vperm.xlu0 %371, %v46_v3   ;;  %375 = vset.pattern.permute.xlu2 %v469_v6 }
  0x18   :  { %54 = vperm.xlu2 %375, %v46_v3   ;;  %149 = vmatpush.bf16.msra.mxu1 %v344_v11 }
  0x19   :  { %202 = vmatpush.bf16.msra.mxu2 %v350_v18  ;;  %256 = vmatpush.bf16.msra.mxu3 %v353_v19 }
  0x1a   :  { %115 = vmatpush.bf16.msra.mxu0 %v347_v24 }
  0x1e   :  { %376 = vset.pattern.permute.xlu1 %v470_v7 }
  0x1f   :  { %378 = vset.pattern.permute.xlu0 %v467_v4  ;;  %68 = vperm.xlu1 %376, %v46_v3  }
  0x20   :  { %377 = vset.pattern.permute.xlu2 %v471_v8 }
  0x21   :  { %72 = vperm.xlu2 %377, %v46_v3  }
  0x68   :  { %v51_v16 = vpop.permute.xlu2 %50 }
  0x69   :  { %vm52_vm0 = vcmp.eq.s32.totalorder %v48_v21, %v51_v16 }
  0x72   :  { %v55_v23 = vpop.permute.xlu2 %54 }
  0x73   :  { %vm56_vm1 = vcmp.eq.s32.totalorder %v48_v21, %v55_v23 }
  0x74   :  { %vm57_vm2 = vmor %vm52_vm0, %vm56_vm1 }
  0x75   :  { %v288_v26 = vsel %vm57_vm2, 1.0, %v472_v25 }
  0x76   :  { %v60_v27 = vpack.c.bf16 %v288_v26, %v288_v26 }
  0x78   :  { %315 = vmatmul.msk.bf16.vlgmr.msra.gmra.mxu1 %vm104_vm3, %v60_v27 }
  0x7b   :  { %v73_v36 = vpop.permute.xlu2 %72 }
  0x7c   :  { %vm74_vm10 = vcmp.eq.s32.totalorder %v48_v21, %v73_v36 }
  0x7f   :  { %v211_v28 = vpop.permute.xlu1 %210 }
  0x80   :  { %v157_v29 = vpop.permute.xlu0 %156  ;;  %vm212_vm4 = vcmp.eq.s32.totalorder %v48_v21, %v211_v28 }
  0x81   :  { %vm158_vm7 = vcmp.eq.s32.totalorder %v48_v21, %v157_v29 }
  0x88   :  { %v215_v30 = vpop.permute.xlu1 %214 }
  0x89   :  { %v161_v31 = vpop.permute.xlu0 %160  ;;  %vm216_vm5 = vcmp.eq.s32.totalorder %v48_v21, %v215_v30 }
  0x8a   :  { %vm162_vm6 = vcmp.eq.s32.totalorder %v48_v21, %v161_v31  ;;  %vm217_vm8 = vmor %vm212_vm4, %vm216_vm5 }
  0x8b   :  { %v330_v32 = vsel %vm217_vm8, 1.0, %v472_v25  ;;  %vm163_vm9 = vmor %vm158_vm7, %vm162_vm6 }
  0x8c   :  { %v220_v33 = vpack.c.bf16 %v330_v32, %v330_v32  ;;  %v316_v34 = vsel %vm163_vm9, 1.0, %v472_v25 }
  0x8d   :  { %v166_v35 = vpack.c.bf16 %v316_v34, %v316_v34 }
  0x8e   :  { %343 = vmatmul.msk.bf16.vlgmr.msra.gmra.mxu3 %vm104_vm3, %v220_v33 }
  0x8f   :  { %329 = vmatmul.msk.bf16.vlgmr.msra.gmra.mxu2 %vm104_vm3, %v166_v35 }
  0x91   :  { %v69_v37 = vpop.permute.xlu1 %68 }
  0x92   :  { %vm70_vm11 = vcmp.eq.s32.totalorder %v48_v21, %v69_v37 }
  0x93   :  { %vm75_vm12 = vmor %vm70_vm11, %vm74_vm10 }
  0x94   :  { %v289_v38 = vsel %vm75_vm12, 1.0, %v472_v25 }
  0x95   :  { %v78_v39 = vpack.c.bf16 %v289_v38, %v289_v38 }
  0x97   :  { %302 = vmatmul.msk.bf16.vlgmr.msra.gmra.mxu0 %vm104_vm3, %v78_v39 }
  0xf5   :  { %v151_v40 = vpop.f32.mrf.mxu1 }
  0xfd   :  { %v153_v41 = vpop.f32.mrf.mxu1 }
 0x111   :  { %v258_v42 = vpop.f32.mrf.mxu3 }
 0x112   :  { %v204_v43 = vpop.f32.mrf.mxu2 }
 0x114   :  { %v117_v44 = vpop.f32.mrf.mxu0 }
 0x115   :  { %v152_v45 = vadd.f32 %v151_v40, %v117_v44 }
 0x117   :  { %v208_v46 = vadd.f32 %v204_v43, %v152_v45 }
 0x119   :  { %v262_v48 = vadd.f32 %v258_v42, %v208_v46  ;;  %v260_v49 = vpop.f32.mrf.mxu3 }
 0x11a   :  { %v206_v50 = vpop.f32.mrf.mxu2 }
 0x11b   :  { %v267_v51 = vadd.f32 %v379_v47, %v262_v48 }
 0x11c   :  { %v119_v52 = vpop.f32.mrf.mxu0 }
 0x11d   :  { %380 = vtanh.f32 %v267_v51 }
 0x123   :  { %v381_v53 = vpop.eup %380 }
 0x124   :  { %269 = vst [vmem:[#allocation7] sm:$0xff] %v381_v53 }
 0x125   :  { %280 = dma.vmem_to_hbm [thread:$0]  %s276_s25, 128, %s278_s28, [#allocation4]  }
 0x126   :  { %458 = dma.done.wait [#allocation4], 128  }
 0x127   :  { %459 = vsyncadd [#allocation4], 4294967168 }
 0x128   :  { %285 = vsyncpa [#allocation3], 1 }
 0x129   :  { %286 = vsyncpa [#allocation6], 1 }
 0x12a   :  { %287 = vsyncpa [#allocation4], 1 }

</bundles_post_ra>
